<compile_context>
chip_gen: v7x
topology: tpu7x:2x2x1
jax: 0.10.0
libtpu: 0.0.40
codegen_flags: <defaults>
</compile_context>

<pallas_src>
import functools

import jax
import jax.numpy as jnp
from jax.experimental import pallas as pl
from jax.experimental.pallas import tpu as pltpu


# ----------------------------- helpers ------------------------------------ #

_MiB = 1024 * 1024


def _lane_tile(dim: int, cap: int) -> int:
    """Lane (last-dim) tile: the full dim when it fits, else a multiple of 128."""
    if dim <= cap:
        return dim
    return max(128, (cap // 128) * 128)


def _rows_for_budget(n_rows: int, row_bytes: int, budget_bytes: int,
                     align: int = 8) -> int:
    """Row tile that keeps one block under `budget_bytes`.  Returns either the
    full `n_rows` or a multiple of `align`, so blocks stay layout-legal even
    for non-dividing shapes (cdiv grids; OOB writes of padded blocks drop)."""
    rows = budget_bytes // max(1, row_bytes)
    if rows >= n_rows:
        return n_rows
    rows = (rows // align) * align
    if rows < align:
        rows = align
    return min(rows, n_rows)


# ----------------------------- kernels ------------------------------------ #

def _token_kernel(x_ref, o_ref):
    # x_ref: (tb, tn0, tc); only row 0 of the token window is the class token.
    o_ref[...] = x_ref[...][:, 0, :]


def _avg_kernel(x_ref, o_ref, acc_ref, *, tn: int, n_tokens: int):
    # "avg" mode is a SUM over the token axis (PyTorch module uses .sum(1)).
    # Grid = (B_tiles, C_tiles, N_tiles); the reduction axis (N) is last.
    n_idx = pl.program_id(2)

    @pl.when(n_idx == 0)
    def _init():
        acc_ref[...] = jnp.zeros_like(acc_ref)

    x = x_ref[...]                                       # (tb, tn, tc)
    if n_tokens % tn != 0:
        # cdiv grid: mask the garbage rows of the padded final token block.
        tok = n_idx * tn + jax.lax.broadcasted_iota(jnp.int32, x.shape, 1)
        x = jnp.where(tok < n_tokens, x, jnp.zeros_like(x))
    acc_ref[...] += jnp.sum(x, axis=1, dtype=jnp.float32)

    @pl.when(n_idx == pl.num_programs(2) - 1)
    def _done():
        o_ref[...] = acc_ref[...].astype(o_ref.dtype)


def _full_kernel(x_ref, o_ref):
    # Tiled transpose: (tn, tc) block of (B, N, C) -> (tc, tn) block of (B, C, N).
    o_ref[...] = jnp.swapaxes(x_ref[...], 0, 1)


def _half_kernel(x_ref, o_ref):
    # x_ref: (thp, 2, Wp, 2, tc) = (h-pair rows, h parity, w pairs, w parity, C).
    # 2x2 max pool = max over the two parity axes; no strided ref loads needed.
    v = x_ref[...]
    v = jnp.max(v, axis=3)                 # w-pair max (size-2 sublane axis)
    o_ref[...] = jnp.max(v, axis=1)        # h-pair max (major axis)


# ----------------------------- wrappers ------------------------------------ #

def _token_pool(x: jax.Array) -> jax.Array:
    B, N, C = x.shape
    nbytes = x.dtype.itemsize
    tn0 = min(8, N)                        # smallest layout-legal token window
    tc = _lane_tile(C, 4096)
    tb = _rows_for_budget(B, tn0 * tc * nbytes, 4 * _MiB)
    return pl.pallas_call(
        _token_kernel,
        grid=(pl.cdiv(B, tb), pl.cdiv(C, tc)),
        in_specs=[pl.BlockSpec((tb, tn0, tc), lambda b, c: (b, 0, c))],
        out_specs=pl.BlockSpec((tb, tc), lambda b, c: (b, c)),
        out_shape=jax.ShapeDtypeStruct((B, C), x.dtype),
        compiler_params=pltpu.CompilerParams(
            dimension_semantics=("parallel", "parallel")),
        cost_estimate=pl.CostEstimate(
            flops=0, transcendentals=0,
            bytes_accessed=int((B * tn0 * C + B * C) * nbytes)),
    )(x)


def _avg_pool(x: jax.Array) -> jax.Array:
    B, N, C = x.shape
    nbytes = x.dtype.itemsize
    tb = min(B, 8)
    tc = _lane_tile(C, 2048)               # full-C rows -> contiguous DMA rows
    tn = _rows_for_budget(N, tb * tc * nbytes, 4 * _MiB)
    kernel = functools.partial(_avg_kernel, tn=tn, n_tokens=N)
    return pl.pallas_call(
        kernel,
        grid=(pl.cdiv(B, tb), pl.cdiv(C, tc), pl.cdiv(N, tn)),
        in_specs=[pl.BlockSpec((tb, tn, tc), lambda b, c, n: (b, n, c))],
        out_specs=pl.BlockSpec((tb, tc), lambda b, c, n: (b, c)),
        out_shape=jax.ShapeDtypeStruct((B, C), x.dtype),
        scratch_shapes=[pltpu.VMEM((tb, tc), jnp.float32)],
        compiler_params=pltpu.CompilerParams(
            dimension_semantics=("parallel", "parallel", "arbitrary")),
        cost_estimate=pl.CostEstimate(
            flops=int(B * N * C), transcendentals=0,
            bytes_accessed=int((B * N * C + B * C) * nbytes)),
    )(x)


def _full_pool(x: jax.Array, flatten: bool) -> jax.Array:
    B, N, C = x.shape
    nbytes = x.dtype.itemsize
    tn = N if N <= 512 else 512            # multiple of 128 or the full dim
    tc = C if C <= 512 else 512
    o = pl.pallas_call(
        _full_kernel,
        grid=(B, pl.cdiv(N, tn), pl.cdiv(C, tc)),
        in_specs=[pl.BlockSpec((None, tn, tc), lambda b, n, c: (b, n, c))],
        out_specs=pl.BlockSpec((None, tc, tn), lambda b, n, c: (b, c, n)),
        out_shape=jax.ShapeDtypeStruct((B, C, N), x.dtype),
        compiler_params=pltpu.CompilerParams(
            dimension_semantics=("parallel", "parallel", "parallel")),
        cost_estimate=pl.CostEstimate(
            flops=0, transcendentals=0,
            bytes_accessed=int(2 * B * N * C * nbytes)),
    )(x)
    return o.reshape(B, C * N) if flatten else o


def _half_pool(x: jax.Array, size, flatten: bool) -> jax.Array:
    B, N, C = x.shape
    H, W = size
    assert N == H * W, "LastPool('half'): N must equal H*W"
    Hp, Wp = H // 2, W // 2
    if Hp == 0 or Wp == 0:
        raise ValueError(f"LastPool('half'): size must be >= 2 in both dims - {size}")
    nbytes = x.dtype.itemsize

    if (H % 2 == 0) and (W % 2 == 0):
        # Free, row-major-preserving metadata reshape exposing the 2x2 windows.
        xg = x.reshape(B, Hp, 2, Wp, 2, C)
    else:
        # max_pool2d(kernel=2, stride=2) floors: drop the trailing row / column.
        # TODO(synk): odd H/W pays one strided XLA slice copy; cover the cropped
        # region via the grid/index_map instead of materializing the slice.
        xg = x.reshape(B, H, W, C)[:, :2 * Hp, :2 * Wp, :].reshape(B, Hp, 2, Wp, 2, C)

    tc = _lane_tile(C, 512)
    # The (2, tc) trailing slabs pad 2 -> 8 sublanes in VMEM; if a single h-pair
    # row is already huge (very wide W), shrink the channel tile instead.
    while tc > 128 and 2 * Wp * 8 * tc * nbytes > 4 * _MiB:
        tc = max(128, (tc // 2 // 128) * 128)
    row_vmem = 2 * Wp * 8 * tc * nbytes
    thp = _rows_for_budget(Hp, row_vmem, 4 * _MiB, align=1)

    o = pl.pallas_call(
        _half_kernel,
        grid=(B, pl.cdiv(Hp, thp), pl.cdiv(C, tc)),
        in_specs=[pl.BlockSpec((None, thp, 2, Wp, 2, tc),
                               lambda b, i, c: (b, i, 0, 0, 0, c))],
        out_specs=pl.BlockSpec((None, thp, Wp, tc), lambda b, i, c: (b, i, 0, c)),
        out_shape=jax.ShapeDtypeStruct((B, Hp, Wp, C), x.dtype),
        compiler_params=pltpu.CompilerParams(
            dimension_semantics=("parallel", "parallel", "parallel")),
        cost_estimate=pl.CostEstimate(
            flops=int(3 * B * Hp * Wp * C), transcendentals=0,
            bytes_accessed=int(5 * B * Hp * Wp * C * nbytes)),
    )(xg)
    # TODO(synk): fold this channel-major permute of the 4x-smaller pooled tensor
    # into the kernel's output layout (needs an in-kernel lane<->sublane transpose).
    o = jnp.transpose(o, (0, 3, 1, 2))          # (B, C, Hp, Wp)
    return o.reshape(B, -1) if flatten else o


# ----------------------------- module ------------------------------------- #

class LastPool:
    """JAX/Pallas port of the PyTorch LastPool module."""

    def __init__(self, pool: str = "token", size=None):
        if not isinstance(pool, str):
            raise TypeError(f"LastPool: pool must be 'avg'|'full'|'half'|'token' - {pool}")
        if pool not in ("avg", "full", "half", "token"):
            raise ValueError(f"LastPool: pool must be 'avg'|'full'|'half'|'token' - {pool}")
        self.pool = pool
        self.size = size
        if pool == "half":
            if not (isinstance(size, (list, tuple))
                    and all(isinstance(s, int) for s in size)):
                raise TypeError(f"LastPool: size must be tuple[int, int] - {size}")
            if len(size) != 2:
                raise ValueError(f"LastPool: size must be tuple[int, int] - {size}")
            # max_pool2d(kernel=2, stride=2, no padding) => floor division
            self.size_after_pool = (size[0] // 2, size[1] // 2)

    def __call__(self, x: jax.Array, flatten: bool = True) -> jax.Array:
        if self.pool == "avg":
            return _avg_pool(x)
        if self.pool == "token":
            return _token_pool(x)
        if self.pool == "full":
            return _full_pool(x, flatten)
        return _half_pool(x, self.size, flatten)


# ----------------------------- reference ---------------------------------- #

def _ref(pool, x, size=None, flatten=True):
    B, N, C = x.shape
    if pool == "avg":
        return jnp.sum(x, axis=1)
    if pool == "token":
        return x[:, 0, :]
    if pool == "full":
        o = jnp.transpose(x, (0, 2, 1))
        return o.reshape(B, -1) if flatten else o
    H, W = size
    o = jnp.transpose(x.reshape(B, H, W, C), (0, 3, 1, 2))    # (B, C, H, W)
    o = o.reshape(B, C, H // 2, 2, W // 2, 2).max(axis=5).max(axis=3)
    return o.reshape(B, -1) if flatten else o


# ------------------------------- main -------------------------------------- #

if __name__ == "__main__":
    key = jax.random.PRNGKey(0)
    B, H, W, C = 2, 4, 4, 32
    N = H * W
    x = jax.random.normal(key, (B, N, C), dtype=jnp.float32)

    configs = [
        ("avg", None, True),
        ("token", None, True),
        ("full", None, True),
        ("full", None, False),
        ("half", (H, W), True),
        ("half", (H, W), False),
    ]
    for pool, size, flatten in configs:
        mod = LastPool(pool=pool, size=size)
        out = jax.block_until_ready(mod(x, flatten=flatten))
        ref = _ref(pool, x, size=size, flatten=flatten)
        assert out.shape == ref.shape, (pool, flatten, out.shape, ref.shape)
        assert jnp.allclose(out, ref, atol=1e-5, rtol=1e-5), f"mismatch in {pool}"

    print("KERNEL_OK")
</pallas_src>

<mosaic_0001>
module attributes {stable_mosaic.version = 11 : i64} {
  func.func @_avg_kernel(%arg0: i32, %arg1: i32, %arg2: i32, %arg3: memref<2x16x32xf32, #tpu.memory_space<vmem>>, %arg4: memref<2x32xf32, #tpu.memory_space<vmem>>, %arg5: memref<2x32xf32, #tpu.memory_space<vmem>>) attributes {dimension_semantics = [#tpu.dimension_semantics<parallel>, #tpu.dimension_semantics<parallel>, #tpu.dimension_semantics<arbitrary>], iteration_bounds = array<i64: 1, 1, 1>, scalar_prefetch = 0 : i64, scratch_operands = 1 : i64, tpu.core_type = #tpu.core_type<tc>, window_params = [{transform_indices = @transform_0, window_bounds = array<i64: 2, 16, 32>}, {transform_indices = @transform_1, window_bounds = array<i64: 2, 32>}]} {
    %c0_i32 = arith.constant 0 : i32
    %0 = arith.cmpi eq, %arg2, %c0_i32 : i32
    %1 = arith.extui %0 : i1 to i32
    %c0_i32_0 = arith.constant 0 : i32
    %2 = arith.cmpi ne, %1, %c0_i32_0 : i32
    scf.if %2 {
      %cst_9 = arith.constant 0.000000e+00 : f32
      %11 = vector.broadcast %cst_9 : f32 to vector<2x32xf32>
      %c0_10 = arith.constant 0 : index
      %c0_11 = arith.constant 0 : index
      %12 = vector.load %arg5[%c0_10, %c0_11] : memref<2x32xf32, #tpu.memory_space<vmem>>, vector<2x32xf32>
      tpu.vector_store %arg5[%c0_10, %c0_11], %11 {strides = array<i32>} : memref<2x32xf32, #tpu.memory_space<vmem>>, vector<2x32xf32>,
    } else {
    }
    %c0 = arith.constant 0 : index
    %c0_1 = arith.constant 0 : index
    %c0_2 = arith.constant 0 : index
    %3 = vector.load %arg3[%c0, %c0_1, %c0_2] : memref<2x16x32xf32, #tpu.memory_space<vmem>>, vector<2x16x32xf32>
    %c0_3 = arith.constant 0 : index
    %c0_4 = arith.constant 0 : index
    %4 = vector.load %arg5[%c0_3, %c0_4] : memref<2x32xf32, #tpu.memory_space<vmem>>, vector<2x32xf32>
    %cst = arith.constant dense<0.000000e+00> : vector<2x32xf32>
    %5 = vector.multi_reduction <add>, %3, %cst [1] : vector<2x16x32xf32> to vector<2x32xf32>
    %6 = arith.addf %4, %5 : vector<2x32xf32>
    %c0_5 = arith.constant 0 : index
    %c0_6 = arith.constant 0 : index
    %7 = vector.load %arg5[%c0_5, %c0_6] : memref<2x32xf32, #tpu.memory_space<vmem>>, vector<2x32xf32>
    tpu.vector_store %arg5[%c0_5, %c0_6], %6 {strides = array<i32>} : memref<2x32xf32, #tpu.memory_space<vmem>>, vector<2x32xf32>,
    %c0_i32_7 = arith.constant 0 : i32
    %8 = arith.cmpi eq, %arg2, %c0_i32_7 : i32
    %9 = arith.extui %8 : i1 to i32
    %c0_i32_8 = arith.constant 0 : i32
    %10 = arith.cmpi ne, %9, %c0_i32_8 : i32
    scf.if %10 {
      %c0_9 = arith.constant 0 : index
      %c0_10 = arith.constant 0 : index
      %11 = vector.load %arg5[%c0_9, %c0_10] : memref<2x32xf32, #tpu.memory_space<vmem>>, vector<2x32xf32>
      %c0_11 = arith.constant 0 : index
      %c0_12 = arith.constant 0 : index
      %12 = vector.load %arg4[%c0_11, %c0_12] : memref<2x32xf32, #tpu.memory_space<vmem>>, vector<2x32xf32>
      tpu.vector_store %arg4[%c0_11, %c0_12], %11 {strides = array<i32>} : memref<2x32xf32, #tpu.memory_space<vmem>>, vector<2x32xf32>,
    } else {
    }
    return
  }
  func.func @transform_0(%arg0: i32, %arg1: i32, %arg2: i32) -> (i32, i32, i32) {
    %c0_i32 = arith.constant 0 : i32
    return %arg0, %arg2, %arg1 : i32, i32, i32
  }
  func.func @transform_1(%arg0: i32, %arg1: i32, %arg2: i32) -> (i32, i32) {
    %c0_i32 = arith.constant 0 : i32
    return %arg0, %arg1 : i32, i32
  }
}

</mosaic_0001>

<bundles_post_ra>
// kernel: tpu_custom_call.1
= control target key start
LH: loop header
LB: loop body
LE: loop exit
PB: predicated region body
PF: predicated region fallthrough
CT: control target
= control target key end

     0   :  { %6 = vsyncpa [#allocation4], 0  ;;  %s176_s0 = inlined_call_operand.hbm [shape: f32[2,16,32], index: 0, kind: input, shape index: {}]   ;;  %s177_s1 = inlined_call_operand.hbm [shape: f32[2,32], index: 1, kind: output, shape index: {}]  }
   0x1   :  { %7 = vsyncpa [#allocation5], 0  ;;  %s134_s6 = smov [#allocation3]   ;;  %s86_s10 = scalar_lea.hbm %s176_s0, 512 }
   0x2   :  { %s13_s7 = sshll.u32 %s134_s6, 4  ;;  %p87_p0 = scmp.ne.s32.totalorder %s176_s0, %s86_s10  ;;  %s14_s7 = int_to_ptr.vmem [resolvable:$true] %s13_s7 }
   0x3   :  { %p90_p1 = scmp.lt.u32.totalorder %s86_s10, %s176_s0 }
   0x5   :  { %p92_p2 = pnand %p90_p1, %p87_p0 }
   0x7   :  { %95 = shalt.err (!%p92_p2)
}
   0x8   :  { %s96_s15 = scalar_lea.vmem %s14_s7, 512  ;;  %p101_p4 = scmp.lt.s32.totalorder %s14_s7, %s14_s7 }
   0x9   :  { %p97_p3 = scmp.ne.s32.totalorder %s14_s7, %s96_s15  ;;  %p102_p5 = scmp.lt.s32.totalorder %s96_s15, %s96_s15 }
   0xb   :  { %p103_p6 = por %p102_p5, %p101_p4 }
   0xd   :  { %p104_p7 = pnand %p103_p6, %p97_p3 }
   0xf   :  { %107 = shalt.err (!%p104_p7)
}
  0x10   :  { %s135_s16 = smov 128   ;;  %s136_s17 = smov 8  }
  0x11   :  { %19 = dma.hbm_to_vmem [thread:$0]  %s176_s0, 512, %s14_s7, [#allocation4], %s135_s16, %s135_s16, %s136_s17  }
  0x12   :  { %130 = dma.done.wait [#allocation4], 512  }
  0x13   :  { %131 = vsyncadd [#allocation4], 4294966784  ;;  %vm27_vm0 = vcmask 254976   ;;  %v137_v0 = vmov 0.0   ;;  %vm34_vm1 = vcmask 261120   ;;  %v29_v1 = vld [vmem:[#allocation3] sm:$0xff] }
  0x14   :  { %28 = vst.msk [vmem:[#allocation2] sm:$0x3] %vm27_vm0, %v137_v0  ;;  %v30_v2 = vld [vmem:[#allocation3 + $0x8] sm:$0xff]  ;;  %v31_v3 = vld [vmem:[#allocation3 + $0x10] sm:$0xff]  ;;  %v32_v4 = vld [vmem:[#allocation3 + $0x18] sm:$0xff]  ;;  %v35_v5 = vsel %vm34_vm1, %v29_v1, 0.0 }
  0x15   :  { %v36_v6 = vsel %vm34_vm1, %v30_v2, 0.0  ;;  %v44_v7 = vsel %vm34_vm1, %v31_v3, 0.0  ;;  %v45_v9 = vsel %vm34_vm1, %v32_v4, 0.0  ;;  %vm55_vm2 = vcmask 1041409   ;;  %s138_s0 = smov [#allocation6]  }
  0x16   :  { %v37_v8 = vadd.f32 %v36_v6, %v35_v5  ;;  %v46_v10 = vadd.f32 %v45_v9, %v44_v7  ;;  %s72_s20 = sshll.u32 %s138_s0, 4  ;;  %s73_s20 = int_to_ptr.vmem [resolvable:$true] %s72_s20 }
  0x17   :  { %s108_s21 = scalar_lea.vmem %s73_s20, 32  ;;  %p113_p9 = scmp.lt.s32.totalorder %s73_s20, %s73_s20 }
  0x18   :  { %v38_v11 = vrot.slane %v37_v8, 4  ;;  %v47_v12 = vrot.slane %v46_v10, 4  ;;  %p109_p8 = scmp.ne.s32.totalorder %s73_s20, %s108_s21  ;;  %p114_p10 = scmp.lt.s32.totalorder %s108_s21, %s108_s21 }
  0x1a   :  { %v39_v13 = vadd.f32 %v38_v11, %v37_v8  ;;  %v48_v14 = vadd.f32 %v47_v12, %v46_v10  ;;  %p115_p11 = por %p114_p10, %p113_p9 }
  0x1b   :  { %v33_v22 = vld [vmem:[#allocation2] sm:$0x3] }
  0x1c   :  { %v40_v15 = vrot.slane %v39_v13, 2  ;;  %v49_v16 = vrot.slane %v48_v14, 2  ;;  %p116_p12 = pnand %p115_p11, %p109_p8 }
  0x1e   :  { %v41_v17 = vadd.f32 %v40_v15, %v39_v13  ;;  %v50_v18 = vadd.f32 %v49_v16, %v48_v14 }
  0x20   :  { %v42_v19 = vrot.slane %v41_v17, 1  ;;  %v51_v20 = vrot.slane %v50_v18, 1 }
  0x22   :  { %v43_v21 = vadd.f32 %v42_v19, %v41_v17  ;;  %v52_v23 = vadd.f32 %v51_v20, %v50_v18 }
  0x24   :  { %v56_v24 = vsel %vm55_vm2, %v52_v23, %v43_v21 }
  0x25   :  { %v58_v25 = vadd.f32 %v56_v24, %v33_v22 }
  0x27   :  { %60 = vst.msk [vmem:[#allocation2] sm:$0x3] %vm27_vm0, %v58_v25 }
  0x2e   :  { %v64_v26 = vld [vmem:[#allocation2] sm:$0x3] }
  0x2f   :  { %65 = vst.msk [vmem:[#allocation6] sm:$0x3] %vm27_vm0, %v64_v26 }
  0x30   :  { %119 = shalt.err (!%p116_p12)
}
  0x31   :  { %s120_s24 = scalar_lea.hbm %s177_s1, 32 }
  0x32   :  { %p121_p13 = scmp.ne.s32.totalorder %s177_s1, %s120_s24  ;;  %p124_p0 = scmp.lt.u32.totalorder %s120_s24, %s177_s1 }
  0x34   :  { %p126_p1 = pnand %p124_p0, %p121_p13 }
  0x36   :  { %129 = shalt.err (!%p126_p1)
}
  0x37   :  { %75 = dma.vmem_to_hbm [thread:$0]  %s73_s20, 32, %s177_s1, [#allocation5]  }
  0x38   :  { %132 = dma.done.wait [#allocation5], 32  }
  0x39   :  { %133 = vsyncadd [#allocation5], 4294967264 }
  0x3a   :  { %79 = vsyncpa [#allocation4], 1 }
  0x3b   :  { %80 = vsyncpa [#allocation5], 1 }

</bundles_post_ra>
